<compile_context>
chip_gen: v6e
topology: v6e:2x2x1
jax: 0.10.0
libtpu: 0.0.40
codegen_flags: <defaults>
</compile_context>

<pallas_src>
import jax
import jax.numpy as jnp
from jax.experimental import pallas as pl
from jax.experimental.pallas import tpu as pltpu


def _round_up(x: int, m: int) -> int:
    return (x + m - 1) // m * m


def make_focal_loss(alpha: float = 1.0, gamma: float = 2.0):
    alpha = float(alpha)
    gamma = float(gamma)

    def focal_loss(logits, targets):
        n, c = logits.shape
        in_itemsize = jnp.dtype(logits.dtype).itemsize

        # ---- generation-aware tile budget -------------------------------
        try:
            vmem_cap = int(pltpu.get_tpu_info().vmem_capacity_bytes)
        except Exception:
            vmem_cap = 64 * 1024 * 1024  # conservative (v7x-sized) fallback

        if vmem_cap <= 64 * 1024 * 1024:          # v7x-class core
            native_budget = 6 * 1024 * 1024
        else:                                      # v5e / v6e (128 MiB VMEM)
            native_budget = 12 * 1024 * 1024
        usable = int(vmem_cap * 0.75)
        # per-row VMEM: 2x double-buffered native input + ~3 full-width f32 temps
        bytes_per_row = 2 * c * in_itemsize + 12 * c
        rows = min(usable // max(1, bytes_per_row),
                   native_budget // max(1, c * in_itemsize))
        tile_n = max(8, min(rows, _round_up(n, 8)))
        tile_n = (tile_n // 8) * 8
        num_blocks = -(-n // tile_n)               # ceil div, ragged last tile OK

        targets2 = targets.astype(jnp.int32).reshape(n, 1)

        # ---- kernel (closes over n / tile_n / alpha / gamma) ------------
        def focal_loss_kernel(logits_ref, targets_ref, out_ref):
            i = pl.program_id(0)
            logits_nat = logits_ref[...]                         # (TN, C) native
            tgt = targets_ref[...]                               # (TN, 1) int32
            tn, cc = logits_nat.shape

            # row-wise max in native dtype (exact), single f32 shifted tile
            m = jnp.max(logits_nat, axis=-1, keepdims=True).astype(jnp.float32)
            shifted = logits_nat.astype(jnp.float32) - m         # (TN, C) f32
            lse = jnp.log(jnp.sum(jnp.exp(shifted), axis=-1, keepdims=True))

            # one-hot gather of the target logit from the NATIVE tile;
            # (1, C) lane iota broadcasts against (TN, 1) targets.
            class_ids = jax.lax.broadcasted_iota(jnp.int32, (1, cc), 1)
            onehot = class_ids == tgt                            # (TN, C) bool
            tgt_logit = jnp.sum(
                jnp.where(onehot, logits_nat, jnp.zeros_like(logits_nat)),
                axis=-1, keepdims=True).astype(jnp.float32)      # (TN, 1)
            tgt_shifted = tgt_logit - m

            ce = lse - tgt_shifted                               # -log p_t
            pt = jnp.minimum(jnp.exp(tgt_shifted - lse), 1.0)
            w = 1.0 - pt
            if gamma == int(gamma) and gamma >= 0:               # multiply chain
                wg = jnp.ones_like(w)
                for _ in range(int(gamma)):
                    wg = wg * w
            else:
                wg = w ** gamma
            focal = alpha * wg * ce                              # (TN, 1)

            # mask rows beyond the true batch size (ragged last tile; the
            # out-of-bounds rows of the block hold unspecified data)
            row_ids = i * tn + jax.lax.broadcasted_iota(jnp.int32, (tn, 1), 0)
            valid = row_ids < n
            partial = jnp.sum(jnp.where(valid, focal, 0.0))      # scalar

            # lane-dense per-block partial: value at [0,0,0], zeros elsewhere
            sub = jax.lax.broadcasted_iota(jnp.int32, (1, 8, 128), 1)
            lane = jax.lax.broadcasted_iota(jnp.int32, (1, 8, 128), 2)
            out_ref[...] = jnp.where((sub == 0) & (lane == 0), partial, 0.0)

        cost = pl.CostEstimate(
            flops=5 * n * c,
            transcendentals=n * c,
            bytes_accessed=n * c * in_itemsize + n * 4 + num_blocks * 8 * 128 * 4,
        )

        partials = pl.pallas_call(
            focal_loss_kernel,
            out_shape=jax.ShapeDtypeStruct((num_blocks, 8, 128), jnp.float32),
            grid=(num_blocks,),
            in_specs=[
                pl.BlockSpec((tile_n, c), lambda i: (i, 0)),     # logits tile
                pl.BlockSpec((tile_n, 1), lambda i: (i, 0)),     # targets tile
            ],
            out_specs=pl.BlockSpec((1, 8, 128), lambda i: (i, 0, 0)),
            compiler_params=pltpu.CompilerParams(
                dimension_semantics=("parallel",),
                vmem_limit_bytes=min(int(vmem_cap * 0.9), 128 * 1024 * 1024),
            ),
            cost_estimate=cost,
        )(logits, targets2)

        # mean over the ORIGINAL batch size; masked rows contributed exactly 0
        return jnp.sum(partials) / jnp.float32(n)

    return focal_loss


def focal_loss_ref(logits, targets, alpha=1.0, gamma=2.0):
    # pure-JAX reference for sanity checking
    logits = logits.astype(jnp.float32)
    log_probs = jax.nn.log_softmax(logits, axis=-1)
    ce = -jnp.take_along_axis(log_probs, targets[:, None].astype(jnp.int32),
                              axis=-1)[:, 0]
    pt = jnp.exp(-ce)
    return jnp.mean(alpha * (1.0 - pt) ** gamma * ce)


if __name__ == "__main__":
    key = jax.random.PRNGKey(0)
    k1, k2 = jax.random.split(key)

    N, C = 8, 32  # batch of 8 samples, 32 classes
    logits = jax.random.normal(k1, (N, C), dtype=jnp.float32)
    targets = jax.random.randint(k2, (N,), 0, C, dtype=jnp.int32)

    focal_loss = make_focal_loss(alpha=1.0, gamma=2.0)

    loss = focal_loss(logits, targets)
    jax.block_until_ready(loss)

    ref = focal_loss_ref(logits, targets, alpha=1.0, gamma=2.0)
    assert jnp.allclose(loss, ref, rtol=1e-4, atol=1e-4), (loss, ref)

    print("KERNEL_OK")
</pallas_src>

<mosaic_0001>
module attributes {stable_mosaic.version = 11 : i64} {
  func.func @focal_loss_kernel(%arg0: i32, %arg1: memref<8x32xf32, #tpu.memory_space<vmem>>, %arg2: memref<8x1xi32, #tpu.memory_space<vmem>>, %arg3: memref<1x8x128xf32, #tpu.memory_space<vmem>>) attributes {dimension_semantics = [#tpu.dimension_semantics<parallel>], iteration_bounds = array<i64: 1>, scalar_prefetch = 0 : i64, scratch_operands = 0 : i64, tpu.core_type = #tpu.core_type<tc>, window_params = [{transform_indices = @transform_0, window_bounds = array<i64: 8, 32>}, {transform_indices = @transform_1, window_bounds = array<i64: 8, 1>}, {transform_indices = @transform_2, window_bounds = array<i64: 1, 8, 128>}]} {
    %c0 = arith.constant 0 : index
    %c0_0 = arith.constant 0 : index
    %0 = vector.load %arg1[%c0, %c0_0] : memref<8x32xf32, #tpu.memory_space<vmem>>, vector<8x32xf32>
    %c0_1 = arith.constant 0 : index
    %c0_2 = arith.constant 0 : index
    %1 = vector.load %arg2[%c0_1, %c0_2] : memref<8x1xi32, #tpu.memory_space<vmem>>, vector<8x1xi32>
    %cst = arith.constant dense<0xFF800000> : vector<8xf32>
    %2 = vector.multi_reduction <maximumf>, %0, %cst [1] : vector<8x32xf32> to vector<8xf32>
    %3 = vector.shape_cast %2 : vector<8xf32> to vector<8x1xf32>
    %4 = vector.broadcast %3 : vector<8x1xf32> to vector<8x32xf32>
    %5 = arith.subf %0, %4 : vector<8x32xf32>
    %6 = math.exp %5 : vector<8x32xf32>
    %cst_3 = arith.constant dense<0.000000e+00> : vector<8xf32>
    %7 = vector.multi_reduction <add>, %6, %cst_3 [1] : vector<8x32xf32> to vector<8xf32>
    %8 = vector.shape_cast %7 : vector<8xf32> to vector<8x1xf32>
    %9 = math.log %8 : vector<8x1xf32>
    %10 = tpu.iota {dimensions = array<i32: 1>} : vector<1x32xi32>
    %11 = vector.broadcast %10 : vector<1x32xi32> to vector<8x32xi32>
    %12 = vector.broadcast %1 : vector<8x1xi32> to vector<8x32xi32>
    %13 = arith.cmpi eq, %11, %12 : vector<8x32xi32>
    %cst_4 = arith.constant 0.000000e+00 : f32
    %14 = vector.broadcast %cst_4 : f32 to vector<8x32xf32>
    %15 = arith.select %13, %0, %14 : vector<8x32xi1>, vector<8x32xf32>
    %cst_5 = arith.constant dense<0.000000e+00> : vector<8xf32>
    %16 = vector.multi_reduction <add>, %15, %cst_5 [1] : vector<8x32xf32> to vector<8xf32>
    %17 = vector.shape_cast %16 : vector<8xf32> to vector<8x1xf32>
    %18 = arith.subf %17, %3 : vector<8x1xf32>
    %19 = arith.subf %9, %18 : vector<8x1xf32>
    %20 = arith.subf %18, %9 : vector<8x1xf32>
    %21 = math.exp %20 : vector<8x1xf32>
    %cst_6 = arith.constant 1.000000e+00 : f32
    %22 = vector.broadcast %cst_6 : f32 to vector<8x1xf32>
    %23 = arith.minimumf %21, %22 : vector<8x1xf32>
    %cst_7 = arith.constant 1.000000e+00 : f32
    %24 = vector.broadcast %cst_7 : f32 to vector<8x1xf32>
    %25 = arith.subf %24, %23 : vector<8x1xf32>
    %cst_8 = arith.constant 1.000000e+00 : f32
    %26 = vector.broadcast %cst_8 : f32 to vector<8x1xf32>
    %27 = arith.mulf %26, %25 : vector<8x1xf32>
    %28 = arith.mulf %27, %25 : vector<8x1xf32>
    %cst_9 = arith.constant 1.000000e+00 : f32
    %29 = vector.broadcast %cst_9 : f32 to vector<8x1xf32>
    %30 = arith.mulf %29, %28 : vector<8x1xf32>
    %31 = arith.mulf %30, %19 : vector<8x1xf32>
    %c8_i32 = arith.constant 8 : i32
    %32 = arith.muli %arg0, %c8_i32 : i32
    %33 = tpu.iota {dimensions = array<i32: 0>} : vector<8x1xi32>
    %34 = vector.broadcast %32 : i32 to vector<8x1xi32>
    %35 = arith.addi %34, %33 : vector<8x1xi32>
    %c8_i32_10 = arith.constant 8 : i32
    %36 = vector.broadcast %c8_i32_10 : i32 to vector<8x1xi32>
    %37 = arith.cmpi slt, %35, %36 : vector<8x1xi32>
    %cst_11 = arith.constant 0.000000e+00 : f32
    %38 = vector.broadcast %cst_11 : f32 to vector<8x1xf32>
    %39 = arith.select %37, %31, %38 : vector<8x1xi1>, vector<8x1xf32>
    %40 = vector.shape_cast %39 : vector<8x1xf32> to vector<1x8x1xf32>
    %cst_12 = arith.constant dense<0.000000e+00> : vector<1xf32>
    %41 = vector.multi_reduction <add>, %40, %cst_12 [1, 2] : vector<1x8x1xf32> to vector<1xf32>
    %42 = vector.shape_cast %41 : vector<1xf32> to vector<1x1x1xf32>
    %43 = vector.extract %42[0, 0, 0] : f32 from vector<1x1x1xf32>
    %44 = tpu.iota {dimensions = array<i32: 1>} : vector<1x8x128xi32>
    %45 = tpu.iota {dimensions = array<i32: 2>} : vector<1x8x128xi32>
    %c0_i32 = arith.constant 0 : i32
    %46 = vector.broadcast %c0_i32 : i32 to vector<1x8x128xi32>
    %47 = arith.cmpi eq, %44, %46 : vector<1x8x128xi32>
    %c0_i32_13 = arith.constant 0 : i32
    %48 = vector.broadcast %c0_i32_13 : i32 to vector<1x8x128xi32>
    %49 = arith.cmpi eq, %45, %48 : vector<1x8x128xi32>
    %50 = arith.andi %47, %49 : vector<1x8x128xi1>
    %cst_14 = arith.constant 0.000000e+00 : f32
    %51 = vector.broadcast %43 : f32 to vector<1x8x128xf32>
    %52 = vector.broadcast %cst_14 : f32 to vector<1x8x128xf32>
    %53 = arith.select %50, %51, %52 : vector<1x8x128xi1>, vector<1x8x128xf32>
    %c0_15 = arith.constant 0 : index
    %c0_16 = arith.constant 0 : index
    %c0_17 = arith.constant 0 : index
    %54 = vector.load %arg3[%c0_15, %c0_16, %c0_17] : memref<1x8x128xf32, #tpu.memory_space<vmem>>, vector<1x8x128xf32>
    tpu.vector_store %arg3[%c0_15, %c0_16, %c0_17], %53 {strides = array<i32>} : memref<1x8x128xf32, #tpu.memory_space<vmem>>, vector<1x8x128xf32>,
    return
  }
  func.func @transform_0(%arg0: i32) -> (i32, i32) {
    %c0_i32 = arith.constant 0 : i32
    %c0_i32_0 = arith.constant 0 : i32
    return %arg0, %c0_i32 : i32, i32
  }
  func.func @transform_1(%arg0: i32) -> (i32, i32) {
    %c0_i32 = arith.constant 0 : i32
    %c0_i32_0 = arith.constant 0 : i32
    return %arg0, %c0_i32 : i32, i32
  }
  func.func @transform_2(%arg0: i32) -> (i32, i32, i32) {
    %c0_i32 = arith.constant 0 : i32
    %c0_i32_0 = arith.constant 0 : i32
    %c0_i32_1 = arith.constant 0 : i32
    return %arg0, %c0_i32, %c0_i32_0 : i32, i32, i32
  }
}

</mosaic_0001>

<bundles_post_ra>
// kernel: tpu_custom_call.1
= control target key start
LH: loop header
LB: loop body
LE: loop exit
PB: predicated region body
PF: predicated region fallthrough
CT: control target
= control target key end

     0   :  { %vm14_vm0 = vcmask 261120   ;;  %s145_s0 = inlined_call_operand.vmem [shape: f32[8,32], index: 0, kind: input, shape index: {}]   ;;  %s146_s1 = inlined_call_operand.vmem [shape: s32[8,1], index: 1, kind: input, shape index: {}]   ;;  %s147_s2 = inlined_call_operand.hbm [shape: f32[1,8,128], index: 2, kind: output, shape index: {}]  }
   0x1   :  { %v12_v0 = vld [vmem:[%s145_s0] sm:$0xff] }
   0x2   :  { %7 = vsyncpa [#allocation3], 0  ;;  %v15_v1 = vsel %vm14_vm0, %v12_v0, -inf  ;;  %v116_v2 = vmov 0   ;;  %v13_v3 = vld [vmem:[%s146_s1] sm:$0xff]  ;;  %v26_v7 = vlaneseq  ;;  %vm52_vm2 = vcmask 7168  }
   0x3   :  { %87 = vset.pattern.permute.xlu0 %v116_v2  ;;  %s117_s0 = smov [#allocation2]  }
   0x4   :  { %16 = vmax.xlane.f32.xlu0 %v15_v1  ;;  %v27_v8 = vand.u32 127, %v26_v7  ;;  %v47_v35 = vshrl.u32 %v26_v7, 7  ;;  %s75_s1 = sshll.u32 %s117_s0, 4  ;;  %s76_s1 = int_to_ptr.vmem [resolvable:$true] %s75_s1 }
   0x5   :  { %s94_s14 = scalar_lea.vmem %s76_s1, 128  ;;  %p99_p1 = scmp.lt.s32.totalorder %s76_s1, %s76_s1 }
   0x6   :  { %vm63_vm3 = vcmp.eq.s32.totalorder %v47_v35, 0  ;;  %vm64_vm4 = vcmp.eq.s32.totalorder %v27_v8, 0  ;;  %p95_p0 = scmp.ne.s32.totalorder %s76_s1, %s94_s14  ;;  %p100_p2 = scmp.lt.s32.totalorder %s94_s14, %s94_s14 }
   0x7   :  { %vm65_vm5 = vmand %vm63_vm3, %vm64_vm4 }
   0x8   :  { %p101_p3 = por %p100_p2, %p99_p1 }
   0xa   :  { %p102_p4 = pnand %p101_p3, %p95_p0 }
  0x1a   :  { %29 = vperm.xlu0 %87, %v13_v3  }
  0x8d   :  { %v17_v4 = vpop.xlane.xlu0 %16 }
  0x8e   :  { %v18_v5 = vsub.f32 %v12_v0, %v17_v4 }
  0x90   :  { %v19_v6 = vmul.f32 1.442695, %v18_v5 }
  0x92   :  { %88 = vpow2.f32 %v19_v6 }
  0x95   :  { %v30_v9 = vpop.permute.xlu0 %29 }
  0x96   :  { %vm31_vm1 = vcmp.eq.s32.totalorder %v27_v8, %v30_v9 }
  0x97   :  { %v32_v11 = vsel %vm31_vm1, %v12_v0, 0.0 }
  0x98   :  { %v33_v13 = vsel %vm14_vm0, %v32_v11, 0.0 }
  0x9f   :  { %v89_v10 = vpop.eup %88 }
  0xa0   :  { %v21_v12 = vsel %vm14_vm0, %v89_v10, 0.0 }
  0xa1   :  { %22 = vadd.xlane.f32.xlu1 %v21_v12 }
  0xa5   :  { %34 = vadd.xlane.f32.xlu1 %v33_v13 }
 0x12a   :  { %v23_v14 = vpop.xlane.xlu1 %22 }
 0x12b   :  { %90 = vlog2.f32 %v23_v14 }
 0x12e   :  { %v35_v15 = vpop.xlane.xlu1 %34 }
 0x12f   :  { %v36_v18 = vsub.f32 %v35_v15, %v17_v4 }
 0x138   :  { %v91_v16 = vpop.eup %90 }
 0x139   :  { %v25_v17 = vmul.f32 0.6931472, %v91_v16 }
 0x13b   :  { %v38_v19 = vsub.f32 %v36_v18, %v25_v17  ;;  %v37_v24 = vsub.f32 %v25_v17, %v36_v18 }
 0x13d   :  { %v39_v20 = vmul.f32 1.442695, %v38_v19 }
 0x13f   :  { %92 = vpow2.f32 %v39_v20 }
 0x14c   :  { %v93_v21 = vpop.eup %92 }
 0x14d   :  { %v41_v22 = vmin.f32 %v93_v21, 1.0 }
 0x14f   :  { %v42_v23 = vsub.f32 1.0, %v41_v22 }
 0x151   :  { %v43_v25 = vmul.f32 %v42_v23, %v42_v23 }
 0x153   :  { %v44_v26 = vmul.f32 %v43_v25, %v37_v24 }
 0x155   :  { %v53_v27 = vsel %vm52_vm2, %v44_v26, 0.0 }
 0x156   :  { %54 = vadd.xlane.f32.xlu1 %v53_v27 }
 0x1df   :  { %v55_v28 = vpop.xlane.xlu1 %54 }
 0x1e0   :  { %v56_v29 = vrot.slane %v55_v28, 4 }
 0x1e2   :  { %v57_v30 = vadd.f32 %v56_v29, %v55_v28 }
 0x1e4   :  { %v58_v31 = vrot.slane %v57_v30, 2 }
 0x1e6   :  { %v59_v32 = vadd.f32 %v58_v31, %v57_v30 }
 0x1e8   :  { %v60_v33 = vrot.slane %v59_v32, 1 }
 0x1ea   :  { %v61_v34 = vadd.f32 %v60_v33, %v59_v32 }
 0x1ec   :  { %83 = vpush %v61_v34 }
 0x21d   :  { %s84_s13 = spop %83 }
 0x21e   :  { %v66_v36 = vstv %s84_s13 }
 0x21f   :  { %v67_v37 = vsel %vm65_vm5, %v66_v36, 0.0 }
 0x220   :  { %68 = vst [vmem:[#allocation2] sm:$0xff] %v67_v37 }
 0x221   :  { %105 = shalt.err (!%p102_p4)
}
 0x222   :  { %78 = dma.vmem_to_hbm [thread:$0]  %s76_s1, 128, %s147_s2, [#allocation3]  }
 0x223   :  { %114 = dma.done.wait [#allocation3], 128  }
 0x224   :  { %115 = vsyncadd [#allocation3], 4294967168 }
 0x225   :  { %82 = vsyncpa [#allocation3], 1 }

</bundles_post_ra>
